<compile_context>
chip_gen: v5e
topology: v5e:2x2
jax: 0.10.0
libtpu: 0.0.40
codegen_flags: <defaults>
</compile_context>

<pallas_src>
import jax
import jax.numpy as jnp
from jax import lax
from jax.experimental import pallas as pl
from jax.experimental.pallas import tpu as pltpu


# ----------------------------------------------------------------------------
# Host-side weight packing: two contiguous slabs + a static layout dict.
# ----------------------------------------------------------------------------
def _block_diag(mats):
    rows = sum(m.shape[0] for m in mats)
    cols = sum(m.shape[1] for m in mats)
    out = jnp.zeros((rows, cols), mats[0].dtype)
    r = c = 0
    for m in mats:
        out = out.at[r:r + m.shape[0], c:c + m.shape[1]].set(m)
        r += m.shape[0]
        c += m.shape[1]
    return out


def _pack_segments(segs):
    """Pack named 2-D f32 arrays into one (rows, lane_pad) slab.
    Every segment starts at a sublane offset that is a multiple of 8."""
    lane_pad = max(128, -(-max(a.shape[1] for _, a in segs) // 128) * 128)
    layout = {}
    chunks = []
    r = 0
    for name, a in segs:
        nr, nc = a.shape
        layout[name] = (r, nr, nc)
        pad_r = (-nr) % 8
        chunk = jnp.zeros((nr + pad_r, lane_pad), jnp.float32)
        chunk = chunk.at[:nr, :nc].set(a.astype(jnp.float32))
        chunks.append(chunk)
        r += nr + pad_r
    return jnp.concatenate(chunks, axis=0), layout


def prepare_model(params):
    """Fuses/flattens all weights into
         wslab: every MXU weight (tap-fused convs, 1x1 downsamples, fused
                N-BEATS stack) in ONE contiguous 2-D buffer,
         bslab: every bias row + the VPU-path weights (width-1 contractions),
       plus the static layout and per-block metadata."""
    K = params["tcn"][0]["w1"].shape[0]
    w_segs, b_segs, meta = [], [], []

    for i, blk in enumerate(params["tcn"]):
        _, c_in, c_out = blk["w1"].shape
        has_down = blk["wd"] is not None
        meta.append((blk["dilation"], c_in, c_out, has_down))

        w1 = blk["w1"].reshape(K * c_in, c_out)            # tap-major stack
        (b_segs if c_in == 1 else w_segs).append((f"b{i}_w1", w1))
        b_segs.append((f"b{i}_b1", blk["b1"].reshape(1, c_out)))

        w2 = blk["w2"].reshape(K * c_out, c_out)
        (b_segs if c_out == 1 else w_segs).append((f"b{i}_w2", w2))
        b_segs.append((f"b{i}_b2", blk["b2"].reshape(1, c_out)))

        if has_down:
            (b_segs if c_in == 1 else w_segs).append(
                (f"b{i}_wd", blk["wd"].reshape(c_in, c_out)))
            b_segs.append((f"b{i}_bd", blk["bd"].reshape(1, c_out)))

    nb = params["nbeats"]
    S, _, H = nb["w1"].shape
    O = nb["wf"].shape[-1]
    # Fused N-BEATS: concat W1 along features, block-diagonal W2/W3, vertically
    # stacked forecast heads (so the stack sum is a single matmul), summed bias.
    w_segs.append(("nb_w1", jnp.concatenate([nb["w1"][s] for s in range(S)], axis=1)))
    b_segs.append(("nb_b1", nb["b1"].reshape(1, S * H)))
    w_segs.append(("nb_w2", _block_diag([nb["w2"][s] for s in range(S)])))
    b_segs.append(("nb_b2", nb["b2"].reshape(1, S * H)))
    w_segs.append(("nb_w3", _block_diag([nb["w3"][s] for s in range(S)])))
    b_segs.append(("nb_b3", nb["b3"].reshape(1, S * H)))
    w_segs.append(("nb_wf", nb["wf"].reshape(S * H, O)))
    b_segs.append(("nb_bf", nb["bf"].sum(axis=0).reshape(1, O)))

    wslab, wlay = _pack_segments(w_segs)
    bslab, blay = _pack_segments(b_segs)
    return wslab, bslab, {"w": wlay, "b": blay}, tuple(meta), K, O


# ----------------------------------------------------------------------------
# Fused kernel: whole TCN + N-BEATS stack, all operands VMEM-resident.
# ----------------------------------------------------------------------------
def _make_fused_kernel(B, L, K, block_meta, layout, mxu_dtype):
    BL = B * L
    shifts = sorted({(K - 1 - k) * d for (d, _, _, _) in block_meta
                     for k in range(K)} - {0})
    shifts = tuple(s for s in shifts if s < L)

    def kernel(x_ref, w_ref, b_ref, out_ref):
        f32 = jnp.float32

        def wmat(name):
            r0, nr, nc = layout["w"][name]
            return w_ref[r0:r0 + nr, 0:nc]                 # (nr, nc) mxu_dtype

        def brow(name):
            r0, nr, nc = layout["b"][name]
            return b_ref[r0:r0 + nr, 0:nc]                 # (nr, nc) f32

        # Per-row position within each length-L sequence (hoisted once; reused
        # by every causal mask).  2-D iota as required on TPU.
        pos = lax.broadcasted_iota(jnp.int32, (BL, 1), 0) % L
        mask = {s: pos >= s for s in shifts}

        def shift_rows(v, s):
            # out[t] = v[t - s] within each length-L sequence, 0 at the causal
            # edge (== left zero-pad + chomp).  roll = XLU, mask = VPU; the
            # (i % L) >= s mask also kills cross-batch wrap-around.
            if s == 0:
                return v
            if s >= L:
                return jnp.zeros_like(v)
            return jnp.where(mask[s], pltpu.roll(v, shift=s, axis=0), 0.0)

        def causal_conv(h, dilation, c_in, c_out, wname, bname):
            taps = [shift_rows(h, (K - 1 - k) * dilation) for k in range(K)]
            bias = brow(bname)                              # (1, c_out) f32
            if c_in == 1:
                # Width-1 contraction: K VPU broadcast-multiplies (bias folded
                # into the first add) instead of a latency-bound MXU op.
                w = brow(wname)                             # (K, c_out) f32
                acc = taps[0] * w[0:1, :] + bias
                for k in range(1, K):
                    acc = acc + taps[k] * w[k:k + 1, :]
            else:
                # All K taps fused into ONE matmul: lane-concat of the shifted
                # copies vs. the host-stacked (K*c_in, c_out) weight.
                hcat = jnp.concatenate(taps, axis=1) if K > 1 else taps[0]
                acc = jnp.dot(hcat.astype(mxu_dtype), wmat(wname),
                              preferred_element_type=f32) + bias
            return jnp.maximum(acc, 0.0)

        # ------------------------------ TCN ------------------------------
        h = x_ref[...].astype(f32)                          # (B*L, 1)
        for i, (d, c_in, c_out, has_down) in enumerate(block_meta):
            h1 = causal_conv(h, d, c_in, c_out, f"b{i}_w1", f"b{i}_b1")
            h2 = causal_conv(h1, d, c_out, c_out, f"b{i}_w2", f"b{i}_b2")
            if has_down:                     # fused 1x1 residual projection
                if c_in == 1:
                    res = h * brow(f"b{i}_wd") + brow(f"b{i}_bd")
                else:
                    res = jnp.dot(h.astype(mxu_dtype), wmat(f"b{i}_wd"),
                                  preferred_element_type=f32) + brow(f"b{i}_bd")
            else:
                res = h
            h = jnp.maximum(h2 + res, 0.0)

        # Last time step of every sequence: static sublane slices + concat
        # (replaces the old selector matmul and its (B, B*L) input).
        feat = jnp.concatenate(
            [h[(b + 1) * L - 1:(b + 1) * L, :] for b in range(B)], axis=0)

        # ----------------- fused N-BEATS stack (forecast) -----------------
        z = feat
        for wname, bname in (("nb_w1", "nb_b1"), ("nb_w2", "nb_b2"),
                             ("nb_w3", "nb_b3")):
            z = jnp.maximum(
                jnp.dot(z.astype(mxu_dtype), wmat(wname),
                        preferred_element_type=f32) + brow(bname), 0.0)
        fc = jnp.dot(z.astype(mxu_dtype), wmat("nb_wf"),
                     preferred_element_type=f32) + brow("nb_bf")
        # TODO(synk): NBeatsBlock also defines a backcast head, but the hybrid
        # forward discards it, so it is intentionally not computed here.
        out_ref[...] = fc.astype(out_ref.dtype)

    return kernel


def make_hybrid_forward(block_meta, K, output_size, B, L, layout,
                        mxu_dtype=jnp.bfloat16):
    """Builds the single fused pallas_call and returns a jitted forward fn."""
    BL = B * L
    kernel = _make_fused_kernel(B, L, K, block_meta, layout, mxu_dtype)
    vmem = pl.BlockSpec(memory_space=pltpu.MemorySpace.VMEM)
    call = pl.pallas_call(
        kernel,
        out_shape=jax.ShapeDtypeStruct((B, output_size), jnp.float32),
        in_specs=[vmem, vmem, vmem],        # x, weight slab, bias slab
        out_specs=vmem,
        # grid=() : single invocation, everything VMEM-resident (tiny model).
        # TODO(synk): for production B*L, add a "parallel" batch grid axis
        # (2x on v7x's two TensorCores) with explicit per-tile BlockSpecs.
    )

    def forward(x, wslab, bslab):
        # (B, L) -> (B*L, 1): batch flattened into the sublane (time) axis.
        x2 = x.reshape(BL, 1).astype(jnp.float32)
        return call(x2, wslab, bslab)

    return jax.jit(forward)


# ----------------------------------------------------------------------------
# Pure-JAX references.  With mxu_dtype=bfloat16 the reference casts exactly
# the operands the kernel feeds to the MXU (contractions wider than 1) and
# keeps f32 accumulation / elementwise math -> matches the kernel to ~f32
# rounding, so the comparison can be tight.
# ----------------------------------------------------------------------------
def reference_forward(x, params, mxu_dtype=jnp.float32):
    HIGH = lax.Precision.HIGHEST
    B, L = x.shape
    f32 = jnp.float32

    def maybe(a, wide):
        return a.astype(mxu_dtype) if wide else a

    h = x[:, :, None].astype(f32)                            # (B, L, 1)
    for blk in params["tcn"]:
        d = blk["dilation"]
        K, c_in, c_out = blk["w1"].shape

        def conv(inp, w, b, wide):
            pad = (K - 1) * d
            xp = jnp.pad(inp, ((0, 0), (pad, 0), (0, 0)))
            acc = jnp.zeros((B, L, w.shape[-1]), f32)
            for k in range(K):
                acc = acc + jnp.einsum(
                    "blc,co->blo", maybe(xp[:, k * d:k * d + L, :], wide),
                    maybe(w[k], wide), precision=HIGH,
                    preferred_element_type=f32)
            return acc + b[None, None, :]

        h1 = jax.nn.relu(conv(h, blk["w1"], blk["b1"], c_in > 1))
        h2 = jax.nn.relu(conv(h1, blk["w2"], blk["b2"], c_out > 1))
        if blk["wd"] is not None:
            res = jnp.einsum("blc,co->blo", maybe(h, c_in > 1),
                             maybe(blk["wd"], c_in > 1), precision=HIGH,
                             preferred_element_type=f32) + blk["bd"][None, None, :]
        else:
            res = h
        h = jax.nn.relu(h2 + res)

    feat = h[:, -1, :]
    nb = params["nbeats"]
    fc = jnp.zeros((B, nb["wf"].shape[-1]), f32)
    for s in range(nb["w1"].shape[0]):
        z = jax.nn.relu(jnp.dot(maybe(feat, True), maybe(nb["w1"][s], True),
                                precision=HIGH, preferred_element_type=f32)
                        + nb["b1"][s])
        z = jax.nn.relu(jnp.dot(maybe(z, True), maybe(nb["w2"][s], True),
                                precision=HIGH, preferred_element_type=f32)
                        + nb["b2"][s])
        z = jax.nn.relu(jnp.dot(maybe(z, True), maybe(nb["w3"][s], True),
                                precision=HIGH, preferred_element_type=f32)
                        + nb["b3"][s])
        fc = fc + jnp.dot(maybe(z, True), maybe(nb["wf"][s], True),
                          precision=HIGH, preferred_element_type=f32) + nb["bf"][s]
    return fc


# ----------------------------------------------------------------------------
# Deterministic parameters.  The module's init_weights() uses normal(0, 0.01)
# weights and zero biases; here the biases are also drawn nonzero so the
# validation exercises every bias-slab offset.  Forward semantics are unchanged.
# ----------------------------------------------------------------------------
def build_params(key, tcn_channels, kernel_size, output_size, hidden_units,
                 stack_depth):
    keys = iter(jax.random.split(key, 128))

    def nrm(shape):
        return 0.01 * jax.random.normal(next(keys), shape, jnp.float32)

    tcn = []
    c_in = 1
    for i, c_out in enumerate(tcn_channels):
        blk = {
            "dilation": 2 ** i,
            "w1": nrm((kernel_size, c_in, c_out)),
            "b1": nrm((c_out,)),
            "w2": nrm((kernel_size, c_out, c_out)),
            "b2": nrm((c_out,)),
            "wd": nrm((c_in, c_out)) if c_in != c_out else None,
            "bd": nrm((c_out,)) if c_in != c_out else None,
        }
        tcn.append(blk)
        c_in = c_out

    c_feat = tcn_channels[-1]
    nbeats = {
        "w1": nrm((stack_depth, c_feat, hidden_units)),
        "b1": nrm((stack_depth, hidden_units)),
        "w2": nrm((stack_depth, hidden_units, hidden_units)),
        "b2": nrm((stack_depth, hidden_units)),
        "w3": nrm((stack_depth, hidden_units, hidden_units)),
        "b3": nrm((stack_depth, hidden_units)),
        "wf": nrm((stack_depth, hidden_units, output_size)),
        "bf": nrm((stack_depth, output_size)),
    }
    return {"tcn": tcn, "nbeats": nbeats}


if __name__ == "__main__":
    B, L = 2, 16                    # batch, sequence length
    output_size = 8
    hidden_units = 32
    stack_depth = 3
    tcn_channels = [8, 16]
    tcn_kernel_size = 3

    key = jax.random.PRNGKey(0)
    k_x, k_p = jax.random.split(key)
    # The torch forward only type-checks for 2-D input (B, L) given Conv1d(1, ...).
    x = jax.random.normal(k_x, (B, L), jnp.float32)

    params = build_params(k_p, tcn_channels, tcn_kernel_size, output_size,
                          hidden_units, stack_depth)
    wslab_f32, bslab, layout, block_meta, K, O = prepare_model(params)

    # Optimized path: bf16 MXU operands (v6e/v7x), f32 accumulation/elementwise.
    wslab = wslab_f32.astype(jnp.bfloat16)
    fwd = make_hybrid_forward(block_meta, K, O, B, L, layout,
                              mxu_dtype=jnp.bfloat16)
    y = fwd(x, wslab, bslab)
    jax.block_until_ready(y)
    assert y.shape == (B, O) and y.dtype == jnp.float32

    # (1) Tight structural check against the precision-matched reference
    #     (same bf16 operand rounding, f32 accumulation).
    y_ref_bf16 = reference_forward(x, params, mxu_dtype=jnp.bfloat16)
    y_ref_f32 = reference_forward(x, params, mxu_dtype=jnp.float32)
    scale = float(jnp.max(jnp.abs(y_ref_f32)))
    diff_m = float(jnp.max(jnp.abs(y - y_ref_bf16)))
    assert diff_m <= 2e-3 * scale + 1e-30, (
        f"kernel vs matched-precision reference: max|diff|={diff_m:.3e}, "
        f"scale={scale:.3e}")

    # (2) Bound the gap to the pure-f32 module semantics: it must not exceed
    #     the intrinsic bf16-operand quantization gap plus the structural tol.
    gap = float(jnp.max(jnp.abs(y_ref_bf16 - y_ref_f32)))
    diff_f = float(jnp.max(jnp.abs(y - y_ref_f32)))
    assert diff_f <= gap + 2e-3 * scale + 1e-30, (
        f"kernel vs f32 reference: max|diff|={diff_f:.3e}, bf16 gap={gap:.3e}, "
        f"scale={scale:.3e}")

    print("KERNEL_OK")
</pallas_src>

<mosaic_0001>
module attributes {stable_mosaic.version = 11 : i64} {
  func.func @kernel(%arg0: memref<32x1xf32, #tpu.memory_space<vmem>>, %arg1: memref<408x128xbf16, #tpu.memory_space<vmem>>, %arg2: memref<96x128xf32, #tpu.memory_space<vmem>>, %arg3: memref<2x8xf32, #tpu.memory_space<vmem>>) attributes {dimension_semantics = [], scalar_prefetch = 0 : i64, scratch_operands = 0 : i64, tpu.core_type = #tpu.core_type<tc>} {
    %0 = tpu.iota {dimensions = array<i32: 0>} : vector<32x1xi32>
    %c16_i32 = arith.constant 16 : i32
    %c0_i32 = arith.constant 0 : i32
    %1 = arith.cmpi eq, %c16_i32, %c0_i32 : i32
    %c1_i32 = arith.constant 1 : i32
    %2 = arith.select %1, %c1_i32, %c16_i32 : i32
    %3 = vector.broadcast %2 : i32 to vector<32x1xi32>
    %4 = arith.remsi %0, %3 : vector<32x1xi32>
    %c0_i32_0 = arith.constant 0 : i32
    %5 = vector.broadcast %c0_i32_0 : i32 to vector<32x1xi32>
    %6 = arith.cmpi ne, %4, %5 : vector<32x1xi32>
    %c0_i32_1 = arith.constant 0 : i32
    %7 = vector.broadcast %c0_i32_1 : i32 to vector<32x1xi32>
    %8 = arith.cmpi slt, %4, %7 : vector<32x1xi32>
    %c0_i32_2 = arith.constant 0 : i32
    %9 = arith.cmpi slt, %2, %c0_i32_2 : i32
    %10 = vector.broadcast %9 : i1 to vector<32x1xi1>
    %11 = vector.broadcast %10 : vector<32x1xi1> to vector<32x1xi1>
    %12 = arith.xori %8, %11 : vector<32x1xi1>
    %13 = arith.andi %12, %6 : vector<32x1xi1>
    %14 = vector.broadcast %2 : i32 to vector<32x1xi32>
    %15 = arith.addi %4, %14 : vector<32x1xi32>
    %16 = arith.select %13, %15, %4 : vector<32x1xi1>, vector<32x1xi32>
    %c1_i32_3 = arith.constant 1 : i32
    %17 = vector.broadcast %c1_i32_3 : i32 to vector<32x1xi32>
    %18 = arith.cmpi sge, %16, %17 : vector<32x1xi32>
    %c2_i32 = arith.constant 2 : i32
    %19 = vector.broadcast %c2_i32 : i32 to vector<32x1xi32>
    %20 = arith.cmpi sge, %16, %19 : vector<32x1xi32>
    %c4_i32 = arith.constant 4 : i32
    %21 = vector.broadcast %c4_i32 : i32 to vector<32x1xi32>
    %22 = arith.cmpi sge, %16, %21 : vector<32x1xi32>
    %c0 = arith.constant 0 : index
    %c0_4 = arith.constant 0 : index
    %23 = vector.load %arg0[%c0, %c0_4] : memref<32x1xf32, #tpu.memory_space<vmem>>, vector<32x1xf32>
    %c2_i32_5 = arith.constant 2 : i32
    %24 = tpu.dynamic_rotate %23 by %c2_i32_5 dim 0 : vector<32x1xf32>, i32 -> vector<32x1xf32>
    %cst = arith.constant 0.000000e+00 : f32
    %25 = vector.broadcast %cst : f32 to vector<32x1xf32>
    %26 = arith.select %20, %24, %25 : vector<32x1xi1>, vector<32x1xf32>
    %c1_i32_6 = arith.constant 1 : i32
    %27 = tpu.dynamic_rotate %23 by %c1_i32_6 dim 0 : vector<32x1xf32>, i32 -> vector<32x1xf32>
    %cst_7 = arith.constant 0.000000e+00 : f32
    %28 = vector.broadcast %cst_7 : f32 to vector<32x1xf32>
    %29 = arith.select %18, %27, %28 : vector<32x1xi1>, vector<32x1xf32>
    %c8 = arith.constant 8 : index
    %c0_8 = arith.constant 0 : index
    %30 = vector.load %arg2[%c8, %c0_8] : memref<96x128xf32, #tpu.memory_space<vmem>>, vector<1x8xf32>
    %c0_9 = arith.constant 0 : index
    %c0_10 = arith.constant 0 : index
    %31 = vector.load %arg2[%c0_9, %c0_10] : memref<96x128xf32, #tpu.memory_space<vmem>>, vector<3x8xf32>
    %32 = vector.extract_strided_slice %31 {offsets = [0, 0], sizes = [1, 8], strides = [1, 1]} : vector<3x8xf32> to vector<1x8xf32>
    %33 = vector.broadcast %26 : vector<32x1xf32> to vector<32x8xf32>
    %34 = vector.broadcast %32 : vector<1x8xf32> to vector<32x8xf32>
    %35 = arith.mulf %33, %34 : vector<32x8xf32>
    %36 = vector.broadcast %30 : vector<1x8xf32> to vector<32x8xf32>
    %37 = arith.addf %35, %36 : vector<32x8xf32>
    %38 = vector.extract_strided_slice %31 {offsets = [1, 0], sizes = [1, 8], strides = [1, 1]} : vector<3x8xf32> to vector<1x8xf32>
    %39 = vector.broadcast %29 : vector<32x1xf32> to vector<32x8xf32>
    %40 = vector.broadcast %38 : vector<1x8xf32> to vector<32x8xf32>
    %41 = arith.mulf %39, %40 : vector<32x8xf32>
    %42 = arith.addf %37, %41 : vector<32x8xf32>
    %43 = vector.extract_strided_slice %31 {offsets = [2, 0], sizes = [1, 8], strides = [1, 1]} : vector<3x8xf32> to vector<1x8xf32>
    %44 = vector.broadcast %23 : vector<32x1xf32> to vector<32x8xf32>
    %45 = vector.broadcast %43 : vector<1x8xf32> to vector<32x8xf32>
    %46 = arith.mulf %44, %45 : vector<32x8xf32>
    %47 = arith.addf %42, %46 : vector<32x8xf32>
    %cst_11 = arith.constant 0.000000e+00 : f32
    %48 = vector.broadcast %cst_11 : f32 to vector<32x8xf32>
    %49 = arith.maximumf %47, %48 : vector<32x8xf32>
    %c2_i32_12 = arith.constant 2 : i32
    %50 = tpu.dynamic_rotate %49 by %c2_i32_12 dim 0 : vector<32x8xf32>, i32 -> vector<32x8xf32>
    %cst_13 = arith.constant 0.000000e+00 : f32
    %51 = vector.shape_cast %20 : vector<32x1xi1> to vector<32x1xi1>
    %52 = vector.broadcast %51 : vector<32x1xi1> to vector<32x8xi1>
    %53 = vector.broadcast %cst_13 : f32 to vector<32x8xf32>
    %54 = arith.select %52, %50, %53 : vector<32x8xi1>, vector<32x8xf32>
    %c1_i32_14 = arith.constant 1 : i32
    %55 = tpu.dynamic_rotate %49 by %c1_i32_14 dim 0 : vector<32x8xf32>, i32 -> vector<32x8xf32>
    %cst_15 = arith.constant 0.000000e+00 : f32
    %56 = vector.shape_cast %18 : vector<32x1xi1> to vector<32x1xi1>
    %57 = vector.broadcast %56 : vector<32x1xi1> to vector<32x8xi1>
    %58 = vector.broadcast %cst_15 : f32 to vector<32x8xf32>
    %59 = arith.select %57, %55, %58 : vector<32x8xi1>, vector<32x8xf32>
    %c16 = arith.constant 16 : index
    %c0_16 = arith.constant 0 : index
    %60 = vector.load %arg2[%c16, %c0_16] : memref<96x128xf32, #tpu.memory_space<vmem>>, vector<1x8xf32>
    %61 = tpu.concatenate %54, %59, %49 in 1 : vector<32x8xf32>, vector<32x8xf32>, vector<32x8xf32> -> vector<32x24xf32>
    %62 = arith.truncf %61 : vector<32x24xf32> to vector<32x24xbf16>
    %c0_17 = arith.constant 0 : index
    %c0_18 = arith.constant 0 : index
    %63 = vector.load %arg1[%c0_17, %c0_18] : memref<408x128xbf16, #tpu.memory_space<vmem>>, vector<24x8xbf16>
    %cst_19 = arith.constant dense<0.000000e+00> : vector<32x8xf32>
    %64 = tpu.matmul %62, %63, %cst_19 {dimension_numbers = #tpu.dot_dimension_numbers<[1], [0], [0], [1], [0, 0, 1, 1], [], []>} : vector<32x24xbf16>, vector<24x8xbf16>, vector<32x8xf32> -> vector<32x8xf32>
    %65 = vector.broadcast %60 : vector<1x8xf32> to vector<32x8xf32>
    %66 = arith.addf %64, %65 : vector<32x8xf32>
    %cst_20 = arith.constant 0.000000e+00 : f32
    %67 = vector.broadcast %cst_20 : f32 to vector<32x8xf32>
    %68 = arith.maximumf %66, %67 : vector<32x8xf32>
    %c24 = arith.constant 24 : index
    %c0_21 = arith.constant 0 : index
    %69 = vector.load %arg2[%c24, %c0_21] : memref<96x128xf32, #tpu.memory_space<vmem>>, vector<1x8xf32>
    %70 = vector.broadcast %23 : vector<32x1xf32> to vector<32x8xf32>
    %71 = vector.broadcast %69 : vector<1x8xf32> to vector<32x8xf32>
    %72 = arith.mulf %70, %71 : vector<32x8xf32>
    %c32 = arith.constant 32 : index
    %c0_22 = arith.constant 0 : index
    %73 = vector.load %arg2[%c32, %c0_22] : memref<96x128xf32, #tpu.memory_space<vmem>>, vector<1x8xf32>
    %74 = vector.broadcast %73 : vector<1x8xf32> to vector<32x8xf32>
    %75 = arith.addf %72, %74 : vector<32x8xf32>
    %76 = arith.addf %68, %75 : vector<32x8xf32>
    %cst_23 = arith.constant 0.000000e+00 : f32
    %77 = vector.broadcast %cst_23 : f32 to vector<32x8xf32>
    %78 = arith.maximumf %76, %77 : vector<32x8xf32>
    %c4_i32_24 = arith.constant 4 : i32
    %79 = tpu.dynamic_rotate %78 by %c4_i32_24 dim 0 : vector<32x8xf32>, i32 -> vector<32x8xf32>
    %cst_25 = arith.constant 0.000000e+00 : f32
    %80 = vector.shape_cast %22 : vector<32x1xi1> to vector<32x1xi1>
    %81 = vector.broadcast %80 : vector<32x1xi1> to vector<32x8xi1>
    %82 = vector.broadcast %cst_25 : f32 to vector<32x8xf32>
    %83 = arith.select %81, %79, %82 : vector<32x8xi1>, vector<32x8xf32>
    %c2_i32_26 = arith.constant 2 : i32
    %84 = tpu.dynamic_rotate %78 by %c2_i32_26 dim 0 : vector<32x8xf32>, i32 -> vector<32x8xf32>
    %cst_27 = arith.constant 0.000000e+00 : f32
    %85 = vector.shape_cast %20 : vector<32x1xi1> to vector<32x1xi1>
    %86 = vector.broadcast %85 : vector<32x1xi1> to vector<32x8xi1>
    %87 = vector.broadcast %cst_27 : f32 to vector<32x8xf32>
    %88 = arith.select %86, %84, %87 : vector<32x8xi1>, vector<32x8xf32>
    %c40 = arith.constant 40 : index
    %c0_28 = arith.constant 0 : index
    %89 = vector.load %arg2[%c40, %c0_28] : memref<96x128xf32, #tpu.memory_space<vmem>>, vector<1x16xf32>
    %90 = tpu.concatenate %83, %88, %78 in 1 : vector<32x8xf32>, vector<32x8xf32>, vector<32x8xf32> -> vector<32x24xf32>
    %91 = arith.truncf %90 : vector<32x24xf32> to vector<32x24xbf16>
    %c24_29 = arith.constant 24 : index
    %c0_30 = arith.constant 0 : index
    %92 = vector.load %arg1[%c24_29, %c0_30] : memref<408x128xbf16, #tpu.memory_space<vmem>>, vector<24x16xbf16>
    %cst_31 = arith.constant dense<0.000000e+00> : vector<32x16xf32>
    %93 = tpu.matmul %91, %92, %cst_31 {dimension_numbers = #tpu.dot_dimension_numbers<[1], [0], [0], [1], [0, 0, 1, 1], [], []>} : vector<32x24xbf16>, vector<24x16xbf16>, vector<32x16xf32> -> vector<32x16xf32>
    %94 = vector.broadcast %89 : vector<1x16xf32> to vector<32x16xf32>
    %95 = arith.addf %93, %94 : vector<32x16xf32>
    %cst_32 = arith.constant 0.000000e+00 : f32
    %96 = vector.broadcast %cst_32 : f32 to vector<32x16xf32>
    %97 = arith.maximumf %95, %96 : vector<32x16xf32>
    %c4_i32_33 = arith.constant 4 : i32
    %98 = tpu.dynamic_rotate %97 by %c4_i32_33 dim 0 : vector<32x16xf32>, i32 -> vector<32x16xf32>
    %cst_34 = arith.constant 0.000000e+00 : f32
    %99 = vector.shape_cast %22 : vector<32x1xi1> to vector<32x1xi1>
    %100 = vector.broadcast %99 : vector<32x1xi1> to vector<32x16xi1>
    %101 = vector.broadcast %cst_34 : f32 to vector<32x16xf32>
    %102 = arith.select %100, %98, %101 : vector<32x16xi1>, vector<32x16xf32>
    %c2_i32_35 = arith.constant 2 : i32
    %103 = tpu.dynamic_rotate %97 by %c2_i32_35 dim 0 : vector<32x16xf32>, i32 -> vector<32x16xf32>
    %cst_36 = arith.constant 0.000000e+00 : f32
    %104 = vector.shape_cast %20 : vector<32x1xi1> to vector<32x1xi1>
    %105 = vector.broadcast %104 : vector<32x1xi1> to vector<32x16xi1>
    %106 = vector.broadcast %cst_36 : f32 to vector<32x16xf32>
    %107 = arith.select %105, %103, %106 : vector<32x16xi1>, vector<32x16xf32>
    %c48 = arith.constant 48 : index
    %c0_37 = arith.constant 0 : index
    %108 = vector.load %arg2[%c48, %c0_37] : memref<96x128xf32, #tpu.memory_space<vmem>>, vector<1x16xf32>
    %109 = tpu.concatenate %102, %107, %97 in 1 : vector<32x16xf32>, vector<32x16xf32>, vector<32x16xf32> -> vector<32x48xf32>
    %110 = arith.truncf %109 : vector<32x48xf32> to vector<32x48xbf16>
    %c48_38 = arith.constant 48 : index
    %c0_39 = arith.constant 0 : index
    %111 = vector.load %arg1[%c48_38, %c0_39] : memref<408x128xbf16, #tpu.memory_space<vmem>>, vector<48x16xbf16>
    %cst_40 = arith.constant dense<0.000000e+00> : vector<32x16xf32>
    %112 = tpu.matmul %110, %111, %cst_40 {dimension_numbers = #tpu.dot_dimension_numbers<[1], [0], [0], [1], [0, 0, 1, 1], [], []>} : vector<32x48xbf16>, vector<48x16xbf16>, vector<32x16xf32> -> vector<32x16xf32>
    %113 = vector.broadcast %108 : vector<1x16xf32> to vector<32x16xf32>
    %114 = arith.addf %112, %113 : vector<32x16xf32>
    %cst_41 = arith.constant 0.000000e+00 : f32
    %115 = vector.broadcast %cst_41 : f32 to vector<32x16xf32>
    %116 = arith.maximumf %114, %115 : vector<32x16xf32>
    %117 = arith.truncf %78 : vector<32x8xf32> to vector<32x8xbf16>
    %c96 = arith.constant 96 : index
    %c0_42 = arith.constant 0 : index
    %118 = vector.load %arg1[%c96, %c0_42] : memref<408x128xbf16, #tpu.memory_space<vmem>>, vector<8x16xbf16>
    %cst_43 = arith.constant dense<0.000000e+00> : vector<32x16xf32>
    %119 = tpu.matmul %117, %118, %cst_43 {dimension_numbers = #tpu.dot_dimension_numbers<[1], [0], [0], [1], [0, 0, 1, 1], [], []>} : vector<32x8xbf16>, vector<8x16xbf16>, vector<32x16xf32> -> vector<32x16xf32>
    %c56 = arith.constant 56 : index
    %c0_44 = arith.constant 0 : index
    %120 = vector.load %arg2[%c56, %c0_44] : memref<96x128xf32, #tpu.memory_space<vmem>>, vector<1x16xf32>
    %121 = vector.broadcast %120 : vector<1x16xf32> to vector<32x16xf32>
    %122 = arith.addf %119, %121 : vector<32x16xf32>
    %123 = arith.addf %116, %122 : vector<32x16xf32>
    %cst_45 = arith.constant 0.000000e+00 : f32
    %124 = vector.broadcast %cst_45 : f32 to vector<32x16xf32>
    %125 = arith.maximumf %123, %124 : vector<32x16xf32>
    %126 = vector.extract_strided_slice %125 {offsets = [15, 0], sizes = [1, 16], strides = [1, 1]} : vector<32x16xf32> to vector<1x16xf32>
    %127 = vector.extract_strided_slice %125 {offsets = [31, 0], sizes = [1, 16], strides = [1, 1]} : vector<32x16xf32> to vector<1x16xf32>
    %128 = tpu.concatenate %126, %127 in 0 : vector<1x16xf32>, vector<1x16xf32> -> vector<2x16xf32>
    %129 = arith.truncf %128 : vector<2x16xf32> to vector<2x16xbf16>
    %c104 = arith.constant 104 : index
    %c0_46 = arith.constant 0 : index
    %130 = vector.load %arg1[%c104, %c0_46] : memref<408x128xbf16, #tpu.memory_space<vmem>>, vector<16x96xbf16>
    %cst_47 = arith.constant dense<0.000000e+00> : vector<2x96xf32>
    %131 = tpu.matmul %129, %130, %cst_47 {dimension_numbers = #tpu.dot_dimension_numbers<[1], [0], [0], [1], [0, 0, 1, 1], [], []>} : vector<2x16xbf16>, vector<16x96xbf16>, vector<2x96xf32> -> vector<2x96xf32>
    %c64 = arith.constant 64 : index
    %c0_48 = arith.constant 0 : index
    %132 = vector.load %arg2[%c64, %c0_48] : memref<96x128xf32, #tpu.memory_space<vmem>>, vector<1x96xf32>
    %133 = vector.broadcast %132 : vector<1x96xf32> to vector<2x96xf32>
    %134 = arith.addf %131, %133 : vector<2x96xf32>
    %cst_49 = arith.constant 0.000000e+00 : f32
    %135 = vector.broadcast %cst_49 : f32 to vector<2x96xf32>
    %136 = arith.maximumf %134, %135 : vector<2x96xf32>
    %137 = arith.truncf %136 : vector<2x96xf32> to vector<2x96xbf16>
    %c120 = arith.constant 120 : index
    %c0_50 = arith.constant 0 : index
    %138 = vector.load %arg1[%c120, %c0_50] : memref<408x128xbf16, #tpu.memory_space<vmem>>, vector<96x96xbf16>
    %cst_51 = arith.constant dense<0.000000e+00> : vector<2x96xf32>
    %139 = tpu.matmul %137, %138, %cst_51 {dimension_numbers = #tpu.dot_dimension_numbers<[1], [0], [0], [1], [0, 0, 1, 1], [], []>} : vector<2x96xbf16>, vector<96x96xbf16>, vector<2x96xf32> -> vector<2x96xf32>
    %c72 = arith.constant 72 : index
    %c0_52 = arith.constant 0 : index
    %140 = vector.load %arg2[%c72, %c0_52] : memref<96x128xf32, #tpu.memory_space<vmem>>, vector<1x96xf32>
    %141 = vector.broadcast %140 : vector<1x96xf32> to vector<2x96xf32>
    %142 = arith.addf %139, %141 : vector<2x96xf32>
    %cst_53 = arith.constant 0.000000e+00 : f32
    %143 = vector.broadcast %cst_53 : f32 to vector<2x96xf32>
    %144 = arith.maximumf %142, %143 : vector<2x96xf32>
    %145 = arith.truncf %144 : vector<2x96xf32> to vector<2x96xbf16>
    %c216 = arith.constant 216 : index
    %c0_54 = arith.constant 0 : index
    %146 = vector.load %arg1[%c216, %c0_54] : memref<408x128xbf16, #tpu.memory_space<vmem>>, vector<96x96xbf16>
    %cst_55 = arith.constant dense<0.000000e+00> : vector<2x96xf32>
    %147 = tpu.matmul %145, %146, %cst_55 {dimension_numbers = #tpu.dot_dimension_numbers<[1], [0], [0], [1], [0, 0, 1, 1], [], []>} : vector<2x96xbf16>, vector<96x96xbf16>, vector<2x96xf32> -> vector<2x96xf32>
    %c80 = arith.constant 80 : index
    %c0_56 = arith.constant 0 : index
    %148 = vector.load %arg2[%c80, %c0_56] : memref<96x128xf32, #tpu.memory_space<vmem>>, vector<1x96xf32>
    %149 = vector.broadcast %148 : vector<1x96xf32> to vector<2x96xf32>
    %150 = arith.addf %147, %149 : vector<2x96xf32>
    %cst_57 = arith.constant 0.000000e+00 : f32
    %151 = vector.broadcast %cst_57 : f32 to vector<2x96xf32>
    %152 = arith.maximumf %150, %151 : vector<2x96xf32>
    %153 = arith.truncf %152 : vector<2x96xf32> to vector<2x96xbf16>
    %c312 = arith.constant 312 : index
    %c0_58 = arith.constant 0 : index
    %154 = vector.load %arg1[%c312, %c0_58] : memref<408x128xbf16, #tpu.memory_space<vmem>>, vector<96x8xbf16>
    %cst_59 = arith.constant dense<0.000000e+00> : vector<2x8xf32>
    %155 = tpu.matmul %153, %154, %cst_59 {dimension_numbers = #tpu.dot_dimension_numbers<[1], [0], [0], [1], [0, 0, 1, 1], [], []>} : vector<2x96xbf16>, vector<96x8xbf16>, vector<2x8xf32> -> vector<2x8xf32>
    %c88 = arith.constant 88 : index
    %c0_60 = arith.constant 0 : index
    %156 = vector.load %arg2[%c88, %c0_60] : memref<96x128xf32, #tpu.memory_space<vmem>>, vector<1x8xf32>
    %157 = vector.broadcast %156 : vector<1x8xf32> to vector<2x8xf32>
    %158 = arith.addf %155, %157 : vector<2x8xf32>
    %c0_61 = arith.constant 0 : index
    %c0_62 = arith.constant 0 : index
    %159 = vector.load %arg3[%c0_61, %c0_62] : memref<2x8xf32, #tpu.memory_space<vmem>>, vector<2x8xf32>
    tpu.vector_store %arg3[%c0_61, %c0_62], %158 {strides = array<i32>} : memref<2x8xf32, #tpu.memory_space<vmem>>, vector<2x8xf32>,
    return
  }
}

</mosaic_0001>

<bundles_post_ra>
// kernel: forward.1
= control target key start
LH: loop header
LB: loop body
LE: loop exit
PB: predicated region body
PF: predicated region fallthrough
CT: control target
= control target key end

     0   :  { %8 = vsyncpa [#allocation3], 0  ;;  %s1449_s0 = inlined_call_operand.vmem [shape: f32[32,1], index: 0, kind: input, shape index: {}]   ;;  %s1450_s1 = inlined_call_operand.hbm [shape: bf16[408,128], index: 1, kind: input, shape index: {}]   ;;  %s1451_s2 = inlined_call_operand.hbm [shape: f32[96,128], index: 2, kind: input, shape index: {}]   ;;  %s1452_s3 = inlined_call_operand.hbm [shape: f32[2,8], index: 3, kind: output, shape index: {}]  }
   0x1   :  { %9 = vsyncpa [#allocation6], 0 }
   0x2   :  { %10 = vsyncpa [#allocation4], 0  ;;  %s17_s14 = sshll.u32 %s1450_s1, 4  ;;  %s1218_s15 = smov [#allocation2]   ;;  %s18_s14 = int_to_ptr.hbm [resolvable:$true] %s17_s14 }
   0x3   :  { %s19_s16 = sshll.u32 %s1218_s15, 4  ;;  %s30_s19 = sshll.u32 %s1451_s2, 4  ;;  %s20_s16 = int_to_ptr.vmem [resolvable:$true] %s19_s16  ;;  %s31_s19 = int_to_ptr.hbm [resolvable:$true] %s30_s19 }
   0x4   :  { %s1219_s20 = smov 64   ;;  %s1220_s21 = smov 4  }
   0x5   :  { %25 = dma.hbm_to_vmem [thread:$0]  %s18_s14, 3264, %s20_s16, [#allocation3], %s1219_s20, %s1219_s20, %s1220_s21  }
   0x6   :  { %s1221_s22 = smov [#allocation5]   ;;  %s1222_s24 = smov 128  }
   0x7   :  { %s32_s23 = sshll.u32 %s1221_s22, 4  ;;  %s1223_s25 = smov 8   ;;  %s33_s23 = int_to_ptr.vmem [resolvable:$true] %s32_s23 }
   0x8   :  { %38 = dma.hbm_to_vmem [thread:$0]  %s31_s19, 1536, %s33_s23, [#allocation6], %s1222_s24, %s1222_s24, %s1223_s25  }
   0x9   :  { %1212 = dma.done.wait [#allocation3], 3264  }
   0xa   :  { %1213 = vsyncadd [#allocation3], 4294964032 }
   0xb   :  { %1214 = dma.done.wait [#allocation6], 1536  }
   0xc   :  { %1215 = vsyncadd [#allocation6], 4294965760  ;;  %v48_v0 = vlaneseq  ;;  %v1224_v1 = vmov 0   ;;  %v115_v3 = vld [vmem:[%s1449_s0 + $0x10] sm:$0xff]  ;;  %v116_v4 = vld [vmem:[%s1449_s0 + $0x18] sm:$0xff]  ;;  %vm342_vm6 = vcmask 1043456  }
   0xd   :  { %1067 = vset.pattern.permute.xlu1 %v1224_v1  ;;  %1066 = vset.pattern.permute.xlu0 %v1224_v1  ;;  %v113_v5 = vld [vmem:[%s1449_s0] sm:$0xff]  ;;  %v119_v6 = vrot.slane %v115_v3, 6  ;;  %v120_v7 = vrot.slane %v116_v4, 6  ;;  %v114_v8 = vld [vmem:[%s1449_s0 + $0x8] sm:$0xff]  ;;  %v132_v10 = vrot.slane %v115_v3, 7  ;;  %v133_v12 = vrot.slane %v116_v4, 7 }
   0xe   :  { %1068 = vset.pattern.permute.xlu2 %v1224_v1  ;;  %v1255_v2 = vshrl.u32 %v48_v0, 7  ;;  %v117_v9 = vrot.slane %v113_v5, 6  ;;  %v118_v11 = vrot.slane %v114_v8, 6  ;;  %v130_v15 = vrot.slane %v113_v5, 7  ;;  %v144_v31 = vld [vmem:[#allocation5] sm:$0x7] }
   0xf   :  { %v131_v19 = vrot.slane %v114_v8, 7  ;;  %v165_v32 = vperm.slane %v144_v31, 0  ;;  %v195_v36 = vperm.slane %v144_v31, 1  ;;  %v1131_v37 = vld [vmem:[#allocation5 + $0x8] ss:$0 sm:$0xff]  ;;  %v224_v41 = vperm.slane %v144_v31, 2 }
  0x10   :  { %vm121_vm0 = vcmp.lt.s32.totalorder %v1255_v2, 2  ;;  %vm134_vm1 = vcmp.lt.s32.totalorder %v1255_v2, 1  ;;  %v1272_v13 = vand.u32 15, %v1255_v2  ;;  %v51_v24 = vadd.s32 16, %v1255_v2  ;;  %s1225_s0 = smov 16   ;;  %s1226_s5 = smov 32  }
  0x11   :  { %v122_v14 = vsel %vm121_vm0, %v119_v6, %v120_v7  ;;  %v124_v16 = vsel %vm121_vm0, %v117_v9, %v118_v11  ;;  %v135_v17 = vsel %vm134_vm1, %v132_v10, %v133_v12  ;;  %v125_v18 = vsel %vm121_vm0, %v120_v7, %v117_v9  ;;  %s1227_s6 = smov [#allocation7]   ;;  %s913_s10 = sshll.u32 %s1452_s3, 4  ;;  %s914_s10 = int_to_ptr.hbm [resolvable:$true] %s913_s10 }
  0x12   :  { %162 = vperm.xlu0 %1066, %v122_v14   ;;  %152 = vperm.xlu1 %1067, %v124_v16   ;;  %vm105_vm2 = vcmp.ge.s32.totalorder %v1272_v13, 2  ;;  %vm101_vm3 = vcmp.ge.s32.totalorder %v1272_v13, 1  ;;  %v138_v20 = vsel %vm134_vm1, %v133_v12, %v130_v15  ;;  %v137_v23 = vsel %vm134_vm1, %v130_v15, %v131_v19  ;;  %s911_s7 = sshll.u32 %s1227_s6, 4  ;;  %s912_s7 = int_to_ptr.vmem [resolvable:$true] %s911_s7 }
  0x13   :  { %192 = vperm.xlu2 %1068, %v135_v17   ;;  %v126_v21 = vsel %vm105_vm2, %v125_v18, 0.0  ;;  %v139_v22 = vsel %vm101_vm3, %v138_v20, 0.0  ;;  %v1293_v25 = vand.u32 15, %v51_v24  ;;  %v123_v26 = vsel %vm121_vm0, %v118_v11, %v119_v6 }
  0x14   :  { %v136_v27 = vsel %vm134_vm1, %v131_v19, %v132_v10  ;;  %vm315_vm7 = vcmask 130048   ;;  %vm310_vm8 = vcmask 64512   ;;  %vm335_vm9 = vcmask 195584  }
  0x15   :  { %vm107_vm4 = vcmp.ge.s32.totalorder %v1293_v25, 2  ;;  %vm103_vm5 = vcmp.ge.s32.totalorder %v1293_v25, 1  ;;  %vm393_vm10 = vcmp.lt.s32.totalorder %v1255_v2, 4  ;;  %vm109_vm11 = vcmp.ge.s32.totalorder %v1272_v13, 4 }
  0x16   :  { %v128_v28 = vsel %vm107_vm4, %v123_v26, 0.0  ;;  %v141_v29 = vsel %vm103_vm5, %v136_v27, 0.0  ;;  %vm111_vm12 = vcmp.ge.s32.totalorder %v1293_v25, 4  ;;  %vm571_vm13 = vcmask 261120   ;;  %v1041_v25 = vld [vmem:[#allocation2 + $0x54] sm:$0xff] }
  0x17   :  { %vm603_vm14 = vcmask 392192   ;;  %vm670_vm15 = vcmask 1040384  }
  0x1a   :  { %147 = vperm.xlu0 %1066, %v126_v21   ;;  %177 = vperm.xlu1 %1067, %v139_v22  }
  0x1b   :  { %182 = vperm.xlu2 %1068, %v137_v23  }
  0x22   :  { %206 = vperm.xlu0 %1066, %v113_v5   ;;  %221 = vperm.xlu1 %1067, %v116_v4  }
  0x23   :  { %211 = vperm.xlu2 %1068, %v114_v8  }
  0x2a   :  { %157 = vperm.xlu0 %1066, %v128_v28   ;;  %187 = vperm.xlu1 %1067, %v141_v29  }
  0x2b   :  { %216 = vperm.xlu2 %1068, %v115_v3  }
  0x6d   :  { %v193_v30 = vpop.permute.xlu2 %192 }
  0x6e   :  { %v199_v50 = vmul.f32 %v195_v36, %v193_v30 }
  0x75   :  { %v183_v34 = vpop.permute.xlu2 %182 }
  0x76   :  { %v197_v39 = vmul.f32 %v195_v36, %v183_v34 }
  0x7d   :  { %v1305_v47 = vpop.permute.xlu2 %211 }
  0x7e   :  { %v226_v48 = vmul.f32 %v224_v41, %v1305_v47 }
  0x84   :  { %v163_v33 = vpop.permute.xlu0 %162  ;;  %v153_v35 = vpop.permute.xlu1 %152 }
  0x85   :  { %v167_v38 = vmul.f32 %v165_v32, %v153_v35  ;;  %v169_v45 = vmul.f32 %v165_v32, %v163_v33  ;;  %v1319_v15 = vpop.permute.xlu2 %216 }
  0x86   :  { %v227_v22 = vmul.f32 %v224_v41, %v1319_v15 }
  0x87   :  { %v172_v40 = vadd.f32 %v1131_v37, %v167_v38  ;;  %v174_v51 = vadd.f32 %v1131_v37, %v169_v45 }
  0x89   :  { %v201_v46 = vadd.f32 %v197_v39, %v172_v40  ;;  %v203_v58 = vadd.f32 %v199_v50, %v174_v51  ;;  %v1032_v40 = vld [vmem:[#allocation2] sm:$0xff] }
  0x8b   :  { %v230_v52 = vadd.f32 %v226_v48, %v201_v46 }
  0x8c   :  { %v148_v42 = vpop.permute.xlu0 %147  ;;  %v178_v44 = vpop.permute.xlu1 %177 }
  0x8d   :  { %v166_v43 = vmul.f32 %v165_v32, %v148_v42  ;;  %v196_v53 = vmul.f32 %v195_v36, %v178_v44  ;;  %v234_v59 = vmax.f32 %v230_v52, 0.0 }
  0x8f   :  { %v171_v49 = vadd.f32 %v1131_v37, %v166_v43  ;;  %v238_v0 = vrot.slane %v234_v59, 6  ;;  %v258_v6 = vrot.slane %v234_v59, 7 }
  0x91   :  { %v200_v55 = vadd.f32 %v196_v53, %v171_v49 }
  0x94   :  { %v1308_v54 = vpop.permute.xlu0 %206  ;;  %v1311_v57 = vpop.permute.xlu1 %221 }
  0x95   :  { %v225_v56 = vmul.f32 %v224_v41, %v1308_v54  ;;  %v228_v60 = vmul.f32 %v224_v41, %v1311_v57 }
  0x97   :  { %v229_v61 = vadd.f32 %v225_v56, %v200_v55  ;;  %v232_v62 = vadd.f32 %v228_v60, %v203_v58 }
  0x99   :  { %v233_v63 = vmax.f32 %v229_v61, 0.0  ;;  %v236_v1 = vmax.f32 %v232_v62, 0.0 }
  0x9b   :  { %v237_v3 = vrot.slane %v233_v63, 6  ;;  %v1074_v4 = vpack.i.bf16 %v234_v59, %v233_v63  ;;  %v257_v5 = vrot.slane %v233_v63, 7  ;;  %v240_v7 = vrot.slane %v236_v1, 6 }
  0x9c   :  { %v158_v8 = vpop.permute.xlu0 %157  ;;  %v260_v9 = vrot.slane %v236_v1, 7  ;;  %v188_v11 = vpop.permute.xlu1 %187 }
  0x9d   :  { %v168_v10 = vmul.f32 %v165_v32, %v158_v8  ;;  %1075 = vrot.lane.b32.xlu1 %v1074_v4, %s1225_s0  ;;  %v263_v12 = vsel %vm134_vm1, %v257_v5, %v258_v6  ;;  %v243_v14 = vsel %vm121_vm0, %v237_v3, %v238_v0  ;;  %v244_v17 = vsel %vm121_vm0, %v240_v7, %v237_v3  ;;  %v1129_v8 = vld [vmem:[#allocation5 + $0x18] ss:$0 sm:$0xff] }
  0x9e   :  { %v264_v16 = vsel %vm134_vm1, %v260_v9, %v257_v5  ;;  %v198_v19 = vmul.f32 %v195_v36, %v188_v11  ;;  %v324_v36 = vld [vmem:[#allocation2 + $0x8] sm:$0xf]  ;;  %v253_v48 = vsel %vm105_vm2, %v244_v17, 0.0  ;;  %v631_v5 = vld [vmem:[#allocation2 + $0x30] sm:$0xf]  ;;  %v371_v11 = vmul.f32 %v1129_v8, %v1308_v54 }
  0x9f   :  { %v173_v18 = vadd.f32 %v1131_v37, %v168_v10  ;;  %v273_v20 = vsel %vm101_vm3, %v264_v16, 0.0  ;;  %v331_v37 = vunpack.c.l.b16 %v324_v36  ;;  %v372_v17 = vmul.f32 %v1129_v8, %v1305_v47 }
  0xa0   :  { %v1069_v21 = vpack.i.bf16 %v263_v12, %v273_v20  ;;  %v1130_v12 = vld [vmem:[#allocation5 + $0x20] ss:$0 sm:$0xff] }
  0xa1   :  { %v202_v23 = vadd.f32 %v198_v19, %v173_v18  ;;  %v333_v38 = vpack.c.b16 %v331_v37, %v331_v37  ;;  %v377_v16 = vadd.f32 %v1130_v12, %v371_v11 }
  0xa2   :  { %1070 = vrot.lane.b32.xlu0 %v1069_v21, %s1223_s25  ;;  %v378_v21 = vadd.f32 %v1130_v12, %v372_v17 }
  0xa3   :  { %v231_v24 = vadd.f32 %v227_v22, %v202_v23  ;;  %v344_v39 = vsel %vm342_vm6, %v333_v38, 0  ;;  %v374_v38 = vmul.f32 %v1129_v8, %v1311_v57 }
  0xa4   :  { %352 = vmatpush.bf16.msra.mxu0 %v344_v39 }
  0xa5   :  { %v235_v26 = vmax.f32 %v231_v24, 0.0 }
  0xa7   :  { %v239_v27 = vrot.slane %v235_v26, 6  ;;  %v1084_v28 = vpack.i.bf16 %v236_v1, %v235_v26  ;;  %v259_v29 = vrot.slane %v235_v26, 7  ;;  %v373_v26 = vmul.f32 %v1129_v8, %v1319_v15 }
  0xa8   :  { %353 = vmatpush.bf16.msra.mxu0 %v1032_v40 }
  0xa9   :  { %v261_v30 = vsel %vm134_vm1, %v259_v29, %v260_v9  ;;  %v262_v31 = vsel %vm134_vm1, %v258_v6, %v259_v29  ;;  %v241_v32 = vsel %vm121_vm0, %v239_v27, %v240_v7  ;;  %v242_v33 = vsel %vm121_vm0, %v238_v0, %v239_v27  ;;  %v1132_v7 = vld [vmem:[#allocation5 + $0x10] ss:$0 sm:$0xff] }
  0xaa   :  { %1085 = vrot.lane.b32.xlu0 %v1084_v28, %s1225_s0  ;;  %v275_v34 = vsel %vm103_vm5, %v262_v31, 0.0  ;;  %v255_v60 = vsel %vm107_vm4, %v242_v33, 0.0  ;;  %v641_v6 = vsel %vm342_vm6, %v631_v5, 0  ;;  %v1033_v5 = vld [vmem:[#allocation2 + $0xc] sm:$0xff]  ;;  %vm904_vm1 = vcmask 58368  }
  0xab   :  { %v1079_v35 = vpack.i.bf16 %v261_v30, %v275_v34  ;;  %650 = vmatpush.bf16.msra.mxu3 %v641_v6  ;;  %v379_v34 = vadd.f32 %v1130_v12, %v373_v26 }
  0xad   :  { %1080 = vrot.lane.b32.xlu2 %v1079_v35, %s1223_s25 }
 0x107   :  { %v1081_v49 = vpop.permute.xlu2 %1080 }
 0x108   :  { %v1083_v56 = vunpack.i.h.bf16 %v1081_v49  ;;  %v1082_v58 = vunpack.i.l.bf16 %v1081_v49 }
 0x10a   :  { %v313_v63 = vsel %vm310_vm8, %v255_v60, %v1082_v58  ;;  %v314_v0 = vsel %vm310_vm8, %v241_v32, %v1083_v56 }
 0x10f   :  { %v1076_v41 = vpop.permute.xlu1 %1075 }
 0x110   :  { %v1078_v45 = vunpack.i.h.bf16 %v1076_v41  ;;  %v1077_v46 = vunpack.i.l.bf16 %v1076_v41 }
 0x114   :  { %v1071_v42 = vpop.permute.xlu0 %1070 }
 0x115   :  { %v1073_v43 = vunpack.i.h.bf16 %v1071_v42  ;;  %v1072_v44 = vunpack.i.l.bf16 %v1071_v42 }
 0x117   :  { %v312_v50 = vsel %vm310_vm8, %v243_v14, %v1073_v43  ;;  %v311_v51 = vsel %vm310_vm8, %v253_v48, %v1072_v44  ;;  %v380_v43 = vadd.f32 %v1130_v12, %v374_v38 }
 0x118   :  { %v316_v52 = vsel %vm315_vm7, %v311_v51, %v1077_v46  ;;  %v317_v53 = vsel %vm315_vm7, %v312_v50, %v1078_v45 }
 0x119   :  { %v320_v55 = vpack.c.bf16 %v317_v53, %v316_v52 }
 0x11b   :  { %928 = vmatmul.msk.bf16.vlgmr.msra.gmra.mxu0 %vm335_vm9, %v320_v55 }
 0x11c   :  { %v1086_v59 = vpop.permute.xlu0 %1085 }
 0x11d   :  { %v1088_v61 = vunpack.i.h.bf16 %v1086_v59  ;;  %v1087_v62 = vunpack.i.l.bf16 %v1086_v59 }
 0x11f   :  { %v318_v1 = vsel %vm315_vm7, %v313_v63, %v1087_v62  ;;  %v319_v3 = vsel %vm315_vm7, %v314_v0, %v1088_v61  ;;  %v467_v0 = vld [vmem:[#allocation2 + $0x14] sm:$0xf] }
 0x120   :  { %v321_v4 = vpack.c.bf16 %v319_v3, %v318_v1  ;;  %v474_v1 = vunpack.c.l.b16 %v467_v0 }
 0x122   :  { %v476_v3 = vpack.c.b16 %v474_v1, %v474_v1 }
 0x12b   :  { %929 = vmatmul.msk.bf16.gmra.mxu0 %vm335_vm9, %v321_v4  ;;  %v485_v4 = vsel %vm342_vm6, %v476_v3, 0 }
 0x12c   :  { %493 = vmatpush.bf16.msra.mxu1 %v485_v4 }
 0x130   :  { %494 = vmatpush.bf16.msra.mxu1 %v1033_v5 }
 0x198   :  { %v355_v9 = vpop.f32.mrf.mxu0 }
 0x199   :  { %v356_v10 = vadd.f32 %v1132_v7, %v355_v9 }
 0x19b   :  { %v365_v14 = vmax.f32 %v356_v10, 0.0 }
 0x19d   :  { %v381_v18 = vadd.f32 %v377_v16, %v365_v14 }
 0x19f   :  { %v385_v23 = vmax.f32 %v381_v18, 0.0 }
 0x1a0   :  { %v357_v19 = vpop.f32.mrf.mxu0 }
 0x1a1   :  { %v358_v20 = vadd.f32 %v1132_v7, %v357_v19  ;;  %v389_v28 = vrot.slane %v385_v23, 4  ;;  %v410_v47 = vrot.slane %v385_v23, 6 }
 0x1a3   :  { %v366_v22 = vmax.f32 %v358_v20, 0.0 }
 0x1a5   :  { %v382_v24 = vadd.f32 %v378_v21, %v366_v22 }
 0x1a7   :  { %v386_v27 = vmax.f32 %v382_v24, 0.0 }
 0x1a8   :  { %v360_v29 = vpop.f32.mrf.mxu0 }
 0x1a9   :  { %v390_v54 = vrot.slane %v386_v27, 4  ;;  %v361_v30 = vadd.f32 %v1132_v7, %v360_v29  ;;  %v1094_v31 = vpack.i.bf16 %v386_v27, %v385_v23  ;;  %v629_v32 = vpack.c.bf16 %v386_v27, %v385_v23 }
 0x1aa   :  { %v411_v33 = vrot.slane %v386_v27, 6 }
 0x1ab   :  { %v367_v35 = vmax.f32 %v361_v30, 0.0  ;;  %1095 = vrot.lane.b32.xlu2 %v1094_v31, %s1225_s0  ;;  %950 = vmatmul.msk.bf16.vlgmr.msra.gmra.mxu3 %vm310_vm8, %v629_v32  ;;  %v396_v15 = vsel %vm393_vm10, %v389_v28, %v390_v54 }
 0x1ac   :  { %v416_v36 = vsel %vm121_vm0, %v410_v47, %v411_v33 }
 0x1ad   :  { %v383_v37 = vadd.f32 %v379_v34, %v367_v35  ;;  %v1134_v35 = vld [vmem:[#allocation5 + $0x28] ss:$0 sm:$0xff] }
 0x1af   :  { %v387_v39 = vmax.f32 %v383_v37, 0.0 }
 0x1b0   :  { %v362_v40 = vpop.f32.mrf.mxu0 }
 0x1b1   :  { %v391_v41 = vrot.slane %v387_v39, 4  ;;  %v363_v42 = vadd.f32 %v1132_v7, %v362_v40  ;;  %v412_v45 = vrot.slane %v387_v39, 6  ;;  %v1036_v40 = vld [vmem:[#allocation2 + $0x28] sm:$0xff] }
 0x1b2   :  { %615 = vmatpush.bf16.msra.mxu2 %v1036_v40  ;;  %v1040_v40 = vld [vmem:[#allocation2 + $0x4c] sm:$0xff] }
 0x1b3   :  { %v368_v44 = vmax.f32 %v363_v42, 0.0  ;;  %v395_v46 = vsel %vm393_vm10, %v390_v54, %v391_v41  ;;  %v415_v50 = vsel %vm121_vm0, %v411_v33, %v412_v45 }
 0x1b4   :  { %v420_v57 = vsel %vm107_vm4, %v415_v50, 0.0  ;;  %v408_v27 = vsel %vm111_vm12, %v395_v46, 0.0 }
 0x1b5   :  { %v384_v48 = vadd.f32 %v380_v43, %v368_v44 }
 0x1b7   :  { %v388_v49 = vmax.f32 %v384_v48, 0.0 }
 0x1b9   :  { %v392_v51 = vrot.slane %v388_v49, 4  ;;  %v630_v52 = vpack.c.bf16 %v388_v49, %v387_v39  ;;  %v413_v53 = vrot.slane %v388_v49, 6  ;;  %v1104_v63 = vpack.i.bf16 %v388_v49, %v387_v39 }
 0x1bb   :  { %951 = vmatmul.msk.bf16.gmra.mxu3 %vm310_vm8, %v630_v52  ;;  %v414_v55 = vsel %vm121_vm0, %v412_v45, %v413_v53  ;;  %v417_v56 = vsel %vm121_vm0, %v413_v53, %v410_v47  ;;  %v394_v58 = vsel %vm393_vm10, %v391_v41, %v392_v51  ;;  %v397_v59 = vsel %vm393_vm10, %v392_v51, %v389_v28 }
 0x1bc   :  { %v1099_v60 = vpack.i.bf16 %v414_v55, %v420_v57  ;;  %v418_v61 = vsel %vm105_vm2, %v417_v56, 0.0  ;;  %v406_v14 = vsel %vm109_vm11, %v397_v59, 0.0 }
 0x1bd   :  { %v1089_v62 = vpack.i.bf16 %v416_v36, %v418_v61 }
 0x1be   :  { %1100 = vrot.lane.b32.xlu0 %v1099_v60, %s1223_s25 }
 0x1bf   :  { %1090 = vrot.lane.b32.xlu1 %v1089_v62, %s1223_s25 }
 0x1c7   :  { %1105 = vrot.lane.b32.xlu1 %v1104_v63, %s1225_s0 }
 0x205   :  { %v1096_v7 = vpop.permute.xlu2 %1095 }
 0x206   :  { %v1098_v11 = vunpack.i.h.bf16 %v1096_v7  ;;  %v1097_v12 = vunpack.i.l.bf16 %v1096_v7 }
 0x22e   :  { %v652_v6 = vpop.f32.mrf.mxu3 }
 0x230   :  { %v1101_v16 = vpop.permute.xlu0 %1100 }
 0x231   :  { %v1091_v8 = vpop.permute.xlu1 %1090  ;;  %v1103_v23 = vunpack.i.h.bf16 %v1101_v16  ;;  %v1102_v24 = vunpack.i.l.bf16 %v1101_v16 }
 0x232   :  { %v1093_v9 = vunpack.i.h.bf16 %v1091_v8  ;;  %v1092_v10 = vunpack.i.l.bf16 %v1091_v8  ;;  %v1035_v8 = vld [vmem:[#allocation2 + $0x20] sm:$0xff] }
 0x233   :  { %v458_v54 = vsel %vm310_vm8, %v394_v58, %v1103_v23  ;;  %v457_v30 = vsel %vm310_vm8, %v408_v27, %v1102_v24  ;;  %616 = vmatpush.bf16.msra.mxu2 %v1035_v8 }
 0x234   :  { %v455_v17 = vsel %vm310_vm8, %v406_v14, %v1092_v10  ;;  %v456_v18 = vsel %vm310_vm8, %v396_v15, %v1093_v9  ;;  %v1034_v9 = vld [vmem:[#allocation2 + $0x18] sm:$0xff] }
 0x235   :  { %v459_v19 = vsel %vm315_vm7, %v455_v17, %v1097_v12  ;;  %v460_v20 = vsel %vm315_vm7, %v456_v18, %v1098_v11 }
 0x236   :  { %v1396_v21 = vpop.f32.mrf.mxu3  ;;  %v463_v22 = vpack.c.bf16 %v460_v20, %v459_v19 }
 0x237   :  { %617 = vmatpush.bf16.msra.mxu2 %v1034_v9  ;;  %v1044_v9 = vld [vmem:[#allocation2 + $0x6c] sm:$0xff] }
 0x238   :  { %934 = vmatmul.msk.bf16.vlgmr.msra.gmra.mxu1 %vm335_vm9, %v463_v22 }
 0x239   :  { %v1106_v26 = vpop.permute.xlu1 %1105 }
 0x23a   :  { %v1108_v28 = vunpack.i.h.bf16 %v1106_v26  ;;  %v1107_v29 = vunpack.i.l.bf16 %v1106_v26 }
 0x23c   :  { %v461_v31 = vsel %vm315_vm7, %v457_v30, %v1107_v29  ;;  %v462_v32 = vsel %vm315_vm7, %v458_v54, %v1108_v28 }
 0x23d   :  { %v464_v33 = vpack.c.bf16 %v462_v32, %v461_v31 }
 0x23e   :  { %v656_v47 = vpop.f32.mrf.mxu3 }
 0x248   :  { %935 = vmatmul.msk.bf16.gmra.mxu1 %vm335_vm9, %v464_v33 }
 0x2b5   :  { %v496_v34 = vpop.f32.mrf.mxu1 }
 0x2b6   :  { %v497_v15 = vadd.f32 %v1134_v35, %v496_v34  ;;  %v1037_v34 = vld [vmem:[#allocation2 + $0x34] sm:$0xff] }
 0x2b7   :  { %693 = vmatpush.bf16.msrb.mxu3 %v1037_v34 }
 0x2b8   :  { %v506_v37 = vmax.f32 %v497_v15, 0.0  ;;  %v1043_v15 = vld [vmem:[#allocation2 + $0x64] sm:$0xff] }
 0x2b9   :  { %757 = vmatpush.bf16.msrb.mxu0 %v1043_v15 }
 0x2ba   :  { %v510_v41 = vrot.slane %v506_v37, 4  ;;  %v522_v58 = vrot.slane %v506_v37, 6 }
 0x2bd   :  { %v498_v36 = vpop.f32.mrf.mxu1 }
 0x2be   :  { %v499_v38 = vadd.f32 %v1134_v35, %v498_v36 }
 0x2c0   :  { %v507_v39 = vmax.f32 %v499_v38, 0.0  ;;  %v1135_v38 = vld [vmem:[#allocation5 + $0x30] ss:$0 sm:$0xff] }
 0x2c2   :  { %v511_v42 = vrot.slane %v507_v39, 4  ;;  %v1114_v43 = vpack.i.bf16 %v507_v39, %v506_v37  ;;  %v523_v53 = vrot.slane %v507_v39, 6  ;;  %v1042_v37 = vld [vmem:[#allocation2 + $0x5c] sm:$0xff] }
 0x2c3   :  { %758 = vmatpush.bf16.msrb.mxu0 %v1042_v37 }
 0x2c4   :  { %1115 = vrot.lane.b32.xlu0 %v1114_v43, %s1226_s5  ;;  %v516_v44 = vsel %vm393_vm10, %v510_v41, %v511_v42  ;;  %v528_v4 = vsel %vm121_vm0, %v522_v58, %v523_v53  ;;  %v1039_v43 = vld [vmem:[#allocation2 + $0x44] sm:$0xff] }
 0x2c5   :  { %v501_v45 = vpop.f32.mrf.mxu1 }
 0x2c6   :  { %v502_v46 = vadd.f32 %v1134_v35, %v501_v45 }
 0x2c7   :  { %759 = vmatpush.bf16.msrb.mxu0 %v1041_v25 }
 0x2c8   :  { %v508_v48 = vmax.f32 %v502_v46, 0.0  ;;  %v657_v46 = vpop.f32.mrf.mxu3 }
 0x2ca   :  { %v512_v49 = vrot.slane %v508_v48, 4  ;;  %v524_v50 = vrot.slane %v508_v48, 6 }
 0x2cb   :  { %760 = vmatpush.bf16.msrb.mxu0 %v1040_v40 }
 0x2cc   :  { %v515_v51 = vsel %vm393_vm10, %v511_v42, %v512_v49  ;;  %v527_v56 = vsel %vm121_vm0, %v523_v53, %v524_v50  ;;  %v1133_v42 = vld [vmem:[#allocation5 + $0x38] ss:$0 sm:$0xff] }
 0x2cd   :  { %v503_v52 = vpop.f32.mrf.mxu1  ;;  %v532_v61 = vsel %vm107_vm4, %v527_v56, 0.0  ;;  %v520_v54 = vsel %vm111_vm12, %v515_v51, 0.0  ;;  %v654_v45 = vadd.f32 %v1133_v42, %v1396_v21  ;;  %v658_v51 = vadd.f32 %v1133_v42, %v657_v46  ;;  %v1049_v21 = vld [vmem:[#allocation2 + $0x94] sm:$0xff] }
 0x2ce   :  { %v504_v57 = vadd.f32 %v1134_v35, %v503_v52  ;;  %825 = vmatpush.bf16.msrb.mxu1 %v1049_v21 }
 0x2cf   :  { %761 = vmatpush.bf16.msrb.mxu0 %v1039_v43 }
 0x2d0   :  { %v509_v55 = vmax.f32 %v504_v57, 0.0 }
 0x2d2   :  { %v513_v59 = vrot.slane %v509_v55, 4  ;;  %v525_v60 = vrot.slane %v509_v55, 6  ;;  %v1124_v7 = vpack.i.bf16 %v509_v55, %v508_v48 }
 0x2d4   :  { %v526_v62 = vsel %vm121_vm0, %v524_v50, %v525_v60  ;;  %v529_v63 = vsel %vm121_vm0, %v525_v60, %v522_v58  ;;  %v517_v0 = vsel %vm393_vm10, %v513_v59, %v510_v41  ;;  %v514_v1 = vsel %vm393_vm10, %v512_v49, %v513_v59 }
 0x2d5   :  { %v1119_v3 = vpack.i.bf16 %v526_v62, %v532_v61  ;;  %v530_v5 = vsel %vm105_vm2, %v529_v63, 0.0  ;;  %v518_v2 = vsel %vm109_vm11, %v517_v0, 0.0  ;;  %v1038_v61 = vld [vmem:[#allocation2 + $0x3c] sm:$0xff]  ;;  %v1048_v62 = vld [vmem:[#allocation2 + $0x8c] sm:$0xff]  ;;  %v1047_v63 = vld [vmem:[#allocation2 + $0x84] sm:$0xff]  ;;  %vm751_vm0 = vcmask 785408  }
 0x2d6   :  { %v1109_v6 = vpack.i.bf16 %v528_v4, %v530_v5  ;;  %762 = vmatpush.bf16.msrb.mxu0 %v1038_v61  ;;  %826 = vmatpush.bf16.msrb.mxu1 %v1048_v62  ;;  %v1046_v0 = vld [vmem:[#allocation2 + $0x7c] sm:$0xff] }
 0x2d7   :  { %1120 = vrot.lane.b32.xlu1 %v1119_v3, %s1225_s0  ;;  %v1136_v3 = vld [vmem:[#allocation5 + $0x40] ss:$0 sm:$0xff] }
 0x2d8   :  { %1110 = vrot.lane.b32.xlu2 %v1109_v6, %s1225_s0 }
 0x2da   :  { %827 = vmatpush.bf16.msrb.mxu1 %v1047_v63 }
 0x2de   :  { %828 = vmatpush.bf16.msrb.mxu1 %v1046_v0 }
 0x2e0   :  { %1125 = vrot.lane.b32.xlu2 %v1124_v7, %s1226_s5 }
 0x332   :  { %v1111_v10 = vpop.permute.xlu2 %1110 }
 0x333   :  { %v1113_v11 = vunpack.i.h.bf16 %v1111_v10  ;;  %v1112_v12 = vunpack.i.l.bf16 %v1111_v10  ;;  %v1055_v10 = vld [vmem:[#allocation2 + $0xc4] sm:$0xff] }
 0x334   :  { %893 = vmatpush.bf16.msrb.mxu2 %v1055_v10 }
 0x335   :  { %v567_v18 = vsel %vm315_vm7, %v518_v2, %v1112_v12  ;;  %v568_v19 = vsel %vm315_vm7, %v516_v44, %v1113_v11  ;;  %v1054_v11 = vld [vmem:[#allocation2 + $0xbc] sm:$0xff]  ;;  %v1053_v12 = vld [vmem:[#allocation2 + $0xb4] sm:$0xff]  ;;  %v1051_v2 = vld [vmem:[#allocation2 + $0xa4] sm:$0xff] }
 0x336   :  { %v1116_v14 = vpop.permute.xlu0 %1115 }
 0x337   :  { %v1118_v16 = vunpack.i.h.bf16 %v1116_v14  ;;  %v1117_v17 = vunpack.i.l.bf16 %v1116_v14  ;;  %v1052_v14 = vld [vmem:[#allocation2 + $0xac] sm:$0xff] }
 0x338   :  { %894 = vmatpush.bf16.msrb.mxu2 %v1054_v11 }
 0x339   :  { %v572_v20 = vsel %vm571_vm13, %v567_v18, %v1117_v17  ;;  %v573_v22 = vsel %vm571_vm13, %v568_v19, %v1118_v16  ;;  %v1137_v16 = vld [vmem:[#allocation5 + $0x48] ss:$0 sm:$0xff] }
 0x33a   :  { %v576_v23 = vpack.c.bf16 %v573_v22, %v572_v20  ;;  %v1126_v24 = vpop.permute.xlu2 %1125 }
 0x33b   :  { %v1128_v29 = vunpack.i.h.bf16 %v1126_v24  ;;  %v1127_v13 = vunpack.i.l.bf16 %v1126_v24  ;;  %v1138_v24 = vld [vmem:[#allocation5 + $0x50] ss:$0 sm:$0xff] }
 0x33c   :  { %948 = vmatmul.msk.bf16.vlgmr.msra.gmra.mxu2 %vm603_vm14, %v576_v23  ;;  %v1050_v23 = vld [vmem:[#allocation2 + $0x9c] sm:$0xff] }
 0x33d   :  { %895 = vmatpush.bf16.msrb.mxu2 %v1053_v12 }
 0x341   :  { %896 = vmatpush.bf16.msrb.mxu2 %v1052_v14 }
 0x345   :  { %897 = vmatpush.bf16.msrb.mxu2 %v1051_v2 }
 0x349   :  { %v1121_v26 = vpop.permute.xlu1 %1120  ;;  %898 = vmatpush.bf16.msrb.mxu2 %v1050_v23 }
 0x34a   :  { %v1123_v27 = vunpack.i.h.bf16 %v1121_v26  ;;  %v1122_v28 = vunpack.i.l.bf16 %v1121_v26 }
 0x34c   :  { %v570_v30 = vsel %vm315_vm7, %v514_v1, %v1123_v27  ;;  %v569_v31 = vsel %vm315_vm7, %v520_v54, %v1122_v28  ;;  %v1045_v1 = vld [vmem:[#allocation2 + $0x74] sm:$0xff]  ;;  %v1139_v54 = vld [vmem:[#allocation5 + $0x58] ss:$0 sm:$0xff] }
 0x34d   :  { %v574_v32 = vsel %vm571_vm13, %v569_v31, %v1127_v13  ;;  %v575_v33 = vsel %vm571_vm13, %v570_v30, %v1128_v29  ;;  %829 = vmatpush.bf16.msrb.mxu1 %v1045_v1 }
 0x34e   :  { %v577_v47 = vpack.c.bf16 %v575_v33, %v574_v32 }
 0x350   :  { %949 = vmatmul.msk.bf16.gmra.mxu2 %vm603_vm14, %v577_v47 }
 0x351   :  { %830 = vmatpush.bf16.msrb.mxu1 %v1044_v9 }
 0x3bf   :  { %v619_v35 = vpop.f32.mrf.mxu2 }
 0x3c7   :  { %v620_v36 = vpop.f32.mrf.mxu2 }
 0x3c8   :  { %v621_v41 = vadd.f32 %v1135_v38, %v620_v36 }
 0x3ca   :  { %v627_v44 = vmax.f32 %v621_v41, 0.0 }
 0x3cc   :  { %v660_v49 = vadd.f32 %v654_v45, %v627_v44 }
 0x3ce   :  { %v662_v53 = vmax.f32 %v660_v49, 0.0 }
 0x3d0   :  { %v665_v56 = vrot.slane %v662_v53, 7 }
 0x3d3   :  { %v623_v39 = vpop.f32.mrf.mxu2 }
 0x3db   :  { %v624_v48 = vpop.f32.mrf.mxu2 }
 0x3dc   :  { %v625_v50 = vadd.f32 %v1135_v38, %v624_v48 }
 0x3de   :  { %v628_v52 = vmax.f32 %v625_v50, 0.0 }
 0x3e0   :  { %v661_v57 = vadd.f32 %v658_v51, %v628_v52 }
 0x3e2   :  { %v663_v55 = vmax.f32 %v661_v57, 0.0 }
 0x3e4   :  { %v668_v58 = vrot.slane %v663_v55, 6 }
 0x3e6   :  { %v671_v59 = vsel %vm670_vm15, %v665_v56, %v668_v58 }
 0x3e7   :  { %v672_v60 = vpack.c.bf16 %v671_v59, %v671_v59 }
 0x3e9   :  { %956 = vmatmul.msk.bf16.vlgmr.msrb.gmra.mxu3 %vm315_vm7, %v672_v60 }
 0x46c   :  { %v695_v4 = vpop.f32.mrf.mxu3 }
 0x46d   :  { %v696_v5 = vadd.f32 %v1136_v3, %v695_v4 }
 0x46f   :  { %v699_v6 = vmax.f32 %v696_v5, 0.0 }
 0x471   :  { %v700_v7 = vpack.c.bf16 %v699_v6, %v699_v6 }
 0x473   :  { %981 = vmatmul.msk.bf16.vlgmr.msrb.gmra.mxu0 %vm751_vm0, %v700_v7 }
 0x474   :  { %v697_v8 = vpop.f32.mrf.mxu3 }
 0x4f0   :  { %v764_v17 = vpop.f32.mrf.mxu0 }
 0x4f1   :  { %v765_v18 = vadd.f32 %v1137_v16, %v764_v17 }
 0x4f3   :  { %v768_v19 = vmax.f32 %v765_v18, 0.0 }
 0x4f5   :  { %v769_v20 = vpack.c.bf16 %v768_v19, %v768_v19 }
 0x4f7   :  { %1006 = vmatmul.msk.bf16.vlgmr.msrb.gmra.mxu1 %vm751_vm0, %v769_v20 }
 0x4f8   :  { %v766_v22 = vpop.f32.mrf.mxu0 }
 0x574   :  { %v832_v26 = vpop.f32.mrf.mxu1 }
 0x575   :  { %v833_v27 = vadd.f32 %v1138_v24, %v832_v26 }
 0x577   :  { %v836_v28 = vmax.f32 %v833_v27, 0.0 }
 0x579   :  { %v837_v29 = vpack.c.bf16 %v836_v28, %v836_v28 }
 0x57b   :  { %1031 = vmatmul.msk.bf16.vlgmr.msrb.gmra.mxu2 %vm751_vm0, %v837_v29 }
 0x57c   :  { %v834_v13 = vpop.f32.mrf.mxu1 }
 0x5fe   :  { %v900_v30 = vpop.f32.mrf.mxu2 }
 0x5ff   :  { %v901_v31 = vadd.f32 %v1139_v54, %v900_v30 }
 0x601   :  { %905 = vst.msk [vmem:[#allocation7] sm:$0x3] %vm904_vm1, %v901_v31 }
 0x602   :  { %916 = dma.vmem_to_hbm [thread:$0]  %s912_s7, 32, %s914_s10, [#allocation4]  }
 0x606   :  { %v902_v32 = vpop.f32.mrf.mxu2 }
 0x607   :  { %1216 = dma.done.wait [#allocation4], 32  }
 0x608   :  { %1217 = vsyncadd [#allocation4], 4294967264 }
 0x609   :  { %921 = vsyncpa [#allocation3], 1 }
 0x60a   :  { %922 = vsyncpa [#allocation6], 1 }
 0x60b   :  { %923 = vsyncpa [#allocation4], 1 }

</bundles_post_ra>
